<compile_context>
chip_gen: v6e
topology: v6e:2x2x1
jax: 0.10.0
libtpu: 0.0.40
codegen_flags: <defaults>
</compile_context>

<pallas_src>
import jax
import jax.numpy as jnp
from jax import lax
from jax.experimental import pallas as pl
from jax.experimental.pallas import tpu as pltpu

TAU = 2.0
V_TH = 1.0


def ms_mlp_kernel(x_ref, w1_ref, b1_ref, w2_ref, b2_ref, o_ref):
    # x_ref: (T, 1, C, N)   o_ref: (T, 1, Cout, N)
    # w1_ref: (Hf, C)  b1_ref: (Hf, 1)  w2_ref: (Cout, Hf)  b2_ref: (Cout, 1)
    T, _, C, N = x_ref.shape
    Hf = w1_ref.shape[0]
    Cout = w2_ref.shape[0]

    # Hoist weight loads and bias broadcasts out of the time loop
    # (JAX does not CSE broadcast_in_dim inside loops).
    w1 = w1_ref[...]
    w2 = w2_ref[...]
    b1 = jnp.broadcast_to(b1_ref[...], (Hf, N))
    b2 = jnp.broadcast_to(b2_ref[...], (Cout, N))

    inv_tau = 1.0 / TAU

    def step(t, carry):
        v1, v2 = carry
        x_t = x_ref[t, 0]                                   # (C, N) float32

        # ---- fc1_lif ----
        h1 = v1 + (x_t - v1) * inv_tau
        s1 = (h1 >= V_TH).astype(jnp.float32)
        v1 = h1 * (1.0 - s1)                                # hard reset to 0

        # ---- fc1_conv (1x1) + fc1_bn (folded):  (Hf, C) @ (C, N) ----
        y1 = jnp.dot(w1, s1, preferred_element_type=jnp.float32) + b1

        # ---- fc2_lif ----
        h2 = v2 + (y1 - v2) * inv_tau
        s2 = (h2 >= V_TH).astype(jnp.float32)
        v2 = h2 * (1.0 - s2)

        # ---- fc2_conv (1x1) + fc2_bn (folded):  (Cout, Hf) @ (Hf, N) ----
        y2 = jnp.dot(w2, s2, preferred_element_type=jnp.float32) + b2

        o_ref[t, 0] = y2                                    # lane-dense store (N lanes)
        return (v1, v2)

    v1_0 = jnp.zeros((C, N), jnp.float32)
    v2_0 = jnp.zeros((Hf, N), jnp.float32)
    lax.fori_loop(0, T, step, (v1_0, v2_0), unroll=True)


def ms_mlp_pallas(x, w1f, b1f, w2f, b2f):
    """x: (T, B, C, H, W) float32.
    w1f: (Hf, C), b1f: (Hf, 1), w2f: (Cout, Hf), b2f: (Cout, 1)
    (eval-mode BN already folded in)."""
    T, B, C, H, W = x.shape
    N = H * W
    Hf = w1f.shape[0]
    Cout = w2f.shape[0]

    # Free reshape only (contiguous) -- no HBM transpose passes.
    x_cn = x.reshape(T, B, C, N).astype(jnp.float32)

    out_cn = pl.pallas_call(
        ms_mlp_kernel,
        out_shape=jax.ShapeDtypeStruct((T, B, Cout, N), jnp.float32),
        grid_spec=pltpu.PrefetchScalarGridSpec(
            num_scalar_prefetch=0,
            grid=(B,),  # T handled by the in-kernel loop; B shards across TCs
            in_specs=[
                pl.BlockSpec((T, 1, C, N), lambda b: (0, b, 0, 0)),
                # Constant-index weight/bias blocks: fetched once by the pipeline.
                pl.BlockSpec((Hf, C), lambda b: (0, 0)),
                pl.BlockSpec((Hf, 1), lambda b: (0, 0)),
                pl.BlockSpec((Cout, Hf), lambda b: (0, 0)),
                pl.BlockSpec((Cout, 1), lambda b: (0, 0)),
            ],
            out_specs=pl.BlockSpec((T, 1, Cout, N), lambda b: (0, b, 0, 0)),
        ),
        compiler_params=pltpu.CompilerParams(
            # B is embarrassingly parallel (LIF state is local to one kernel
            # invocation); do NOT put T on the grid -- the recurrence is serial.
            dimension_semantics=("parallel",),
        ),
    )(x_cn, w1f, b1f, w2f, b2f)

    return out_cn.reshape(T, B, Cout, H, W)


# ------------------------- pure-JAX reference -------------------------------
def lif_scan(seq):  # seq: (T, ...)
    def step(v, xt):
        h = v + (xt - v) / TAU
        s = (h >= V_TH).astype(jnp.float32)
        return h * (1.0 - s), s

    _, spikes = lax.scan(step, jnp.zeros_like(seq[0]), seq)
    return spikes


def ms_mlp_ref(x, w1, bias1, bn1, w2, bias2, bn2):
    T, B, C, H, W = x.shape
    N = H * W
    xf = x.reshape(T, B, C, N)
    s1 = lif_scan(xf)
    y1 = jnp.einsum('tbcn,hc->tbhn', s1, w1) + bias1[None, None, :, None]
    g1, be1, m1, v1 = bn1
    y1 = (y1 - m1[None, None, :, None]) / jnp.sqrt(v1 + 1e-5)[None, None, :, None]
    y1 = y1 * g1[None, None, :, None] + be1[None, None, :, None]
    s2 = lif_scan(y1)
    y2 = jnp.einsum('tbhn,ch->tbcn', s2, w2) + bias2[None, None, :, None]
    g2, be2, m2, v2 = bn2
    y2 = (y2 - m2[None, None, :, None]) / jnp.sqrt(v2 + 1e-5)[None, None, :, None]
    y2 = y2 * g2[None, None, :, None] + be2[None, None, :, None]
    return y2.reshape(T, B, C, H, W)


if __name__ == "__main__":
    # N = H*W = 256 (multiple of 128 -> lane-dense); C, Hf multiples of 8.
    T, B, C, H, W = 4, 2, 16, 16, 16
    Hf = 32           # hidden_features
    Cout = C          # out_features defaults to in_features

    key = jax.random.PRNGKey(0)
    keys = jax.random.split(key, 12)

    x = 2.0 * jax.random.normal(keys[0], (T, B, C, H, W), jnp.float32)

    # Conv1d weights (out, in) for kernel_size=1; biases
    w1 = 0.3 * jax.random.normal(keys[1], (Hf, C), jnp.float32)
    bias1 = 0.1 * jax.random.normal(keys[2], (Hf,), jnp.float32)
    w2 = 0.3 * jax.random.normal(keys[3], (Cout, Hf), jnp.float32)
    bias2 = 0.1 * jax.random.normal(keys[4], (Cout,), jnp.float32)

    # BatchNorm1d (eval mode) params: gamma, beta, running_mean, running_var
    bn1 = (1.0 + 0.1 * jax.random.normal(keys[5], (Hf,), jnp.float32),
           0.1 * jax.random.normal(keys[6], (Hf,), jnp.float32),
           0.1 * jax.random.normal(keys[7], (Hf,), jnp.float32),
           jnp.abs(1.0 + 0.1 * jax.random.normal(keys[8], (Hf,), jnp.float32)))
    bn2 = (1.0 + 0.1 * jax.random.normal(keys[9], (Cout,), jnp.float32),
           0.1 * jax.random.normal(keys[10], (Cout,), jnp.float32),
           0.1 * jax.random.normal(keys[11], (Cout,), jnp.float32),
           jnp.ones((Cout,), jnp.float32))
    # TODO(synk): training-mode BatchNorm (batch statistics) not implemented;
    # eval-mode BN with running stats is folded into the conv weights.

    def fold(w, b, bn):
        g, be, m, v = bn
        scale = g / jnp.sqrt(v + 1e-5)
        w_f = w * scale[:, None]                      # (out, in) for (out,in)@(in,N)
        b_f = (b * scale + (be - m * scale))[:, None]  # (out, 1)
        return w_f.astype(jnp.float32), b_f.astype(jnp.float32)

    w1f, b1f = fold(w1, bias1, bn1)
    w2f, b2f = fold(w2, bias2, bn2)

    out = ms_mlp_pallas(x, w1f, b1f, w2f, b2f)
    out = jax.block_until_ready(out)

    ref = ms_mlp_ref(x, w1, bias1, bn1, w2, bias2, bn2)
    assert out.shape == (T, B, Cout, H, W)
    assert jnp.max(jnp.abs(out - ref)) < 2e-4

    print("KERNEL_OK")
</pallas_src>

<mosaic_0001>
module attributes {stable_mosaic.version = 11 : i64} {
  func.func @ms_mlp_kernel(%arg0: i32, %arg1: memref<4x1x16x256xf32, #tpu.memory_space<vmem>>, %arg2: memref<32x16xf32, #tpu.memory_space<vmem>>, %arg3: memref<32x1xf32, #tpu.memory_space<vmem>>, %arg4: memref<16x32xf32, #tpu.memory_space<vmem>>, %arg5: memref<16x1xf32, #tpu.memory_space<vmem>>, %arg6: memref<4x1x16x256xf32, #tpu.memory_space<vmem>>) attributes {dimension_semantics = [#tpu.dimension_semantics<parallel>], iteration_bounds = array<i64: 2>, scalar_prefetch = 0 : i64, scratch_operands = 0 : i64, tpu.core_type = #tpu.core_type<tc>, window_params = [{transform_indices = @transform_0, window_bounds = array<i64: 4, 1, 16, 256>}, {pipeline_mode = #tpu.pipeline_mode<synchronous>, transform_indices = @transform_1, window_bounds = array<i64: 32, 16>}, {pipeline_mode = #tpu.pipeline_mode<synchronous>, transform_indices = @transform_2, window_bounds = array<i64: 32, 1>}, {pipeline_mode = #tpu.pipeline_mode<synchronous>, transform_indices = @transform_3, window_bounds = array<i64: 16, 32>}, {pipeline_mode = #tpu.pipeline_mode<synchronous>, transform_indices = @transform_4, window_bounds = array<i64: 16, 1>}, {transform_indices = @transform_5, window_bounds = array<i64: 4, 1, 16, 256>}]} {
    %c0 = arith.constant 0 : index
    %c0_0 = arith.constant 0 : index
    %0 = vector.load %arg2[%c0, %c0_0] : memref<32x16xf32, #tpu.memory_space<vmem>>, vector<32x16xf32>
    %c0_1 = arith.constant 0 : index
    %c0_2 = arith.constant 0 : index
    %1 = vector.load %arg4[%c0_1, %c0_2] : memref<16x32xf32, #tpu.memory_space<vmem>>, vector<16x32xf32>
    %c0_3 = arith.constant 0 : index
    %c0_4 = arith.constant 0 : index
    %2 = vector.load %arg3[%c0_3, %c0_4] : memref<32x1xf32, #tpu.memory_space<vmem>>, vector<32x1xf32>
    %3 = vector.shape_cast %2 : vector<32x1xf32> to vector<32x1xf32>
    %4 = vector.broadcast %3 : vector<32x1xf32> to vector<32x256xf32>
    %c0_5 = arith.constant 0 : index
    %c0_6 = arith.constant 0 : index
    %5 = vector.load %arg5[%c0_5, %c0_6] : memref<16x1xf32, #tpu.memory_space<vmem>>, vector<16x1xf32>
    %6 = vector.shape_cast %5 : vector<16x1xf32> to vector<16x1xf32>
    %7 = vector.broadcast %6 : vector<16x1xf32> to vector<16x256xf32>
    %cst = arith.constant 0.000000e+00 : f32
    %8 = vector.broadcast %cst : f32 to vector<16x256xf32>
    %cst_7 = arith.constant 0.000000e+00 : f32
    %9 = vector.broadcast %cst_7 : f32 to vector<32x256xf32>
    %c0_i32 = arith.constant 0 : i32
    %10 = arith.index_cast %c0_i32 : i32 to index
    %c0_8 = arith.constant 0 : index
    %c0_9 = arith.constant 0 : index
    %c0_10 = arith.constant 0 : index
    %11 = vector.load %arg1[%10, %c0_8, %c0_9, %c0_10] : memref<4x1x16x256xf32, #tpu.memory_space<vmem>>, vector<1x1x16x256xf32>
    %12 = vector.shape_cast %11 : vector<1x1x16x256xf32> to vector<16x256xf32>
    %13 = arith.subf %12, %8 : vector<16x256xf32>
    %cst_11 = arith.constant 5.000000e-01 : f32
    %14 = vector.broadcast %cst_11 : f32 to vector<16x256xf32>
    %15 = arith.mulf %13, %14 : vector<16x256xf32>
    %16 = arith.addf %8, %15 : vector<16x256xf32>
    %cst_12 = arith.constant 1.000000e+00 : f32
    %17 = vector.broadcast %cst_12 : f32 to vector<16x256xf32>
    %18 = arith.cmpf oge, %16, %17 : vector<16x256xf32>
    %19 = arith.extui %18 : vector<16x256xi1> to vector<16x256xi32>
    %20 = arith.sitofp %19 : vector<16x256xi32> to vector<16x256xf32>
    %cst_13 = arith.constant 1.000000e+00 : f32
    %21 = vector.broadcast %cst_13 : f32 to vector<16x256xf32>
    %22 = arith.subf %21, %20 : vector<16x256xf32>
    %23 = arith.mulf %16, %22 : vector<16x256xf32>
    %cst_14 = arith.constant dense<0.000000e+00> : vector<32x256xf32>
    %24 = tpu.matmul %0, %20, %cst_14 {dimension_numbers = #tpu.dot_dimension_numbers<[1], [0], [0], [1], [0, 0, 1, 1], [], []>} : vector<32x16xf32>, vector<16x256xf32>, vector<32x256xf32> -> vector<32x256xf32>
    %25 = arith.addf %24, %4 : vector<32x256xf32>
    %26 = arith.subf %25, %9 : vector<32x256xf32>
    %cst_15 = arith.constant 5.000000e-01 : f32
    %27 = vector.broadcast %cst_15 : f32 to vector<32x256xf32>
    %28 = arith.mulf %26, %27 : vector<32x256xf32>
    %29 = arith.addf %9, %28 : vector<32x256xf32>
    %cst_16 = arith.constant 1.000000e+00 : f32
    %30 = vector.broadcast %cst_16 : f32 to vector<32x256xf32>
    %31 = arith.cmpf oge, %29, %30 : vector<32x256xf32>
    %32 = arith.extui %31 : vector<32x256xi1> to vector<32x256xi32>
    %33 = arith.sitofp %32 : vector<32x256xi32> to vector<32x256xf32>
    %cst_17 = arith.constant 1.000000e+00 : f32
    %34 = vector.broadcast %cst_17 : f32 to vector<32x256xf32>
    %35 = arith.subf %34, %33 : vector<32x256xf32>
    %36 = arith.mulf %29, %35 : vector<32x256xf32>
    %cst_18 = arith.constant dense<0.000000e+00> : vector<16x256xf32>
    %37 = tpu.matmul %1, %33, %cst_18 {dimension_numbers = #tpu.dot_dimension_numbers<[1], [0], [0], [1], [0, 0, 1, 1], [], []>} : vector<16x32xf32>, vector<32x256xf32>, vector<16x256xf32> -> vector<16x256xf32>
    %38 = arith.addf %37, %7 : vector<16x256xf32>
    %39 = arith.index_cast %c0_i32 : i32 to index
    %c0_19 = arith.constant 0 : index
    %c0_20 = arith.constant 0 : index
    %c0_21 = arith.constant 0 : index
    %40 = vector.load %arg6[%39, %c0_19, %c0_20, %c0_21] : memref<4x1x16x256xf32, #tpu.memory_space<vmem>>, vector<1x1x16x256xf32>
    %41 = vector.shape_cast %40 : vector<1x1x16x256xf32> to vector<16x256xf32>
    %42 = vector.shape_cast %38 : vector<16x256xf32> to vector<1x1x16x256xf32>
    tpu.vector_store %arg6[%39, %c0_19, %c0_20, %c0_21], %42 {strides = array<i32>} : memref<4x1x16x256xf32, #tpu.memory_space<vmem>>, vector<1x1x16x256xf32>,
    %c1_i32 = arith.constant 1 : i32
    %43 = arith.index_cast %c1_i32 : i32 to index
    %c0_22 = arith.constant 0 : index
    %c0_23 = arith.constant 0 : index
    %c0_24 = arith.constant 0 : index
    %44 = vector.load %arg1[%43, %c0_22, %c0_23, %c0_24] : memref<4x1x16x256xf32, #tpu.memory_space<vmem>>, vector<1x1x16x256xf32>
    %45 = vector.shape_cast %44 : vector<1x1x16x256xf32> to vector<16x256xf32>
    %46 = arith.subf %45, %23 : vector<16x256xf32>
    %cst_25 = arith.constant 5.000000e-01 : f32
    %47 = vector.broadcast %cst_25 : f32 to vector<16x256xf32>
    %48 = arith.mulf %46, %47 : vector<16x256xf32>
    %49 = arith.addf %23, %48 : vector<16x256xf32>
    %cst_26 = arith.constant 1.000000e+00 : f32
    %50 = vector.broadcast %cst_26 : f32 to vector<16x256xf32>
    %51 = arith.cmpf oge, %49, %50 : vector<16x256xf32>
    %52 = arith.extui %51 : vector<16x256xi1> to vector<16x256xi32>
    %53 = arith.sitofp %52 : vector<16x256xi32> to vector<16x256xf32>
    %cst_27 = arith.constant 1.000000e+00 : f32
    %54 = vector.broadcast %cst_27 : f32 to vector<16x256xf32>
    %55 = arith.subf %54, %53 : vector<16x256xf32>
    %56 = arith.mulf %49, %55 : vector<16x256xf32>
    %cst_28 = arith.constant dense<0.000000e+00> : vector<32x256xf32>
    %57 = tpu.matmul %0, %53, %cst_28 {dimension_numbers = #tpu.dot_dimension_numbers<[1], [0], [0], [1], [0, 0, 1, 1], [], []>} : vector<32x16xf32>, vector<16x256xf32>, vector<32x256xf32> -> vector<32x256xf32>
    %58 = arith.addf %57, %4 : vector<32x256xf32>
    %59 = arith.subf %58, %36 : vector<32x256xf32>
    %cst_29 = arith.constant 5.000000e-01 : f32
    %60 = vector.broadcast %cst_29 : f32 to vector<32x256xf32>
    %61 = arith.mulf %59, %60 : vector<32x256xf32>
    %62 = arith.addf %36, %61 : vector<32x256xf32>
    %cst_30 = arith.constant 1.000000e+00 : f32
    %63 = vector.broadcast %cst_30 : f32 to vector<32x256xf32>
    %64 = arith.cmpf oge, %62, %63 : vector<32x256xf32>
    %65 = arith.extui %64 : vector<32x256xi1> to vector<32x256xi32>
    %66 = arith.sitofp %65 : vector<32x256xi32> to vector<32x256xf32>
    %cst_31 = arith.constant 1.000000e+00 : f32
    %67 = vector.broadcast %cst_31 : f32 to vector<32x256xf32>
    %68 = arith.subf %67, %66 : vector<32x256xf32>
    %69 = arith.mulf %62, %68 : vector<32x256xf32>
    %cst_32 = arith.constant dense<0.000000e+00> : vector<16x256xf32>
    %70 = tpu.matmul %1, %66, %cst_32 {dimension_numbers = #tpu.dot_dimension_numbers<[1], [0], [0], [1], [0, 0, 1, 1], [], []>} : vector<16x32xf32>, vector<32x256xf32>, vector<16x256xf32> -> vector<16x256xf32>
    %71 = arith.addf %70, %7 : vector<16x256xf32>
    %72 = arith.index_cast %c1_i32 : i32 to index
    %c0_33 = arith.constant 0 : index
    %c0_34 = arith.constant 0 : index
    %c0_35 = arith.constant 0 : index
    %73 = vector.load %arg6[%72, %c0_33, %c0_34, %c0_35] : memref<4x1x16x256xf32, #tpu.memory_space<vmem>>, vector<1x1x16x256xf32>
    %74 = vector.shape_cast %73 : vector<1x1x16x256xf32> to vector<16x256xf32>
    %75 = vector.shape_cast %71 : vector<16x256xf32> to vector<1x1x16x256xf32>
    tpu.vector_store %arg6[%72, %c0_33, %c0_34, %c0_35], %75 {strides = array<i32>} : memref<4x1x16x256xf32, #tpu.memory_space<vmem>>, vector<1x1x16x256xf32>,
    %c2_i32 = arith.constant 2 : i32
    %76 = arith.index_cast %c2_i32 : i32 to index
    %c0_36 = arith.constant 0 : index
    %c0_37 = arith.constant 0 : index
    %c0_38 = arith.constant 0 : index
    %77 = vector.load %arg1[%76, %c0_36, %c0_37, %c0_38] : memref<4x1x16x256xf32, #tpu.memory_space<vmem>>, vector<1x1x16x256xf32>
    %78 = vector.shape_cast %77 : vector<1x1x16x256xf32> to vector<16x256xf32>
    %79 = arith.subf %78, %56 : vector<16x256xf32>
    %cst_39 = arith.constant 5.000000e-01 : f32
    %80 = vector.broadcast %cst_39 : f32 to vector<16x256xf32>
    %81 = arith.mulf %79, %80 : vector<16x256xf32>
    %82 = arith.addf %56, %81 : vector<16x256xf32>
    %cst_40 = arith.constant 1.000000e+00 : f32
    %83 = vector.broadcast %cst_40 : f32 to vector<16x256xf32>
    %84 = arith.cmpf oge, %82, %83 : vector<16x256xf32>
    %85 = arith.extui %84 : vector<16x256xi1> to vector<16x256xi32>
    %86 = arith.sitofp %85 : vector<16x256xi32> to vector<16x256xf32>
    %cst_41 = arith.constant 1.000000e+00 : f32
    %87 = vector.broadcast %cst_41 : f32 to vector<16x256xf32>
    %88 = arith.subf %87, %86 : vector<16x256xf32>
    %89 = arith.mulf %82, %88 : vector<16x256xf32>
    %cst_42 = arith.constant dense<0.000000e+00> : vector<32x256xf32>
    %90 = tpu.matmul %0, %86, %cst_42 {dimension_numbers = #tpu.dot_dimension_numbers<[1], [0], [0], [1], [0, 0, 1, 1], [], []>} : vector<32x16xf32>, vector<16x256xf32>, vector<32x256xf32> -> vector<32x256xf32>
    %91 = arith.addf %90, %4 : vector<32x256xf32>
    %92 = arith.subf %91, %69 : vector<32x256xf32>
    %cst_43 = arith.constant 5.000000e-01 : f32
    %93 = vector.broadcast %cst_43 : f32 to vector<32x256xf32>
    %94 = arith.mulf %92, %93 : vector<32x256xf32>
    %95 = arith.addf %69, %94 : vector<32x256xf32>
    %cst_44 = arith.constant 1.000000e+00 : f32
    %96 = vector.broadcast %cst_44 : f32 to vector<32x256xf32>
    %97 = arith.cmpf oge, %95, %96 : vector<32x256xf32>
    %98 = arith.extui %97 : vector<32x256xi1> to vector<32x256xi32>
    %99 = arith.sitofp %98 : vector<32x256xi32> to vector<32x256xf32>
    %cst_45 = arith.constant 1.000000e+00 : f32
    %100 = vector.broadcast %cst_45 : f32 to vector<32x256xf32>
    %101 = arith.subf %100, %99 : vector<32x256xf32>
    %102 = arith.mulf %95, %101 : vector<32x256xf32>
    %cst_46 = arith.constant dense<0.000000e+00> : vector<16x256xf32>
    %103 = tpu.matmul %1, %99, %cst_46 {dimension_numbers = #tpu.dot_dimension_numbers<[1], [0], [0], [1], [0, 0, 1, 1], [], []>} : vector<16x32xf32>, vector<32x256xf32>, vector<16x256xf32> -> vector<16x256xf32>
    %104 = arith.addf %103, %7 : vector<16x256xf32>
    %105 = arith.index_cast %c2_i32 : i32 to index
    %c0_47 = arith.constant 0 : index
    %c0_48 = arith.constant 0 : index
    %c0_49 = arith.constant 0 : index
    %106 = vector.load %arg6[%105, %c0_47, %c0_48, %c0_49] : memref<4x1x16x256xf32, #tpu.memory_space<vmem>>, vector<1x1x16x256xf32>
    %107 = vector.shape_cast %106 : vector<1x1x16x256xf32> to vector<16x256xf32>
    %108 = vector.shape_cast %104 : vector<16x256xf32> to vector<1x1x16x256xf32>
    tpu.vector_store %arg6[%105, %c0_47, %c0_48, %c0_49], %108 {strides = array<i32>} : memref<4x1x16x256xf32, #tpu.memory_space<vmem>>, vector<1x1x16x256xf32>,
    %c3_i32 = arith.constant 3 : i32
    %109 = arith.index_cast %c3_i32 : i32 to index
    %c0_50 = arith.constant 0 : index
    %c0_51 = arith.constant 0 : index
    %c0_52 = arith.constant 0 : index
    %110 = vector.load %arg1[%109, %c0_50, %c0_51, %c0_52] : memref<4x1x16x256xf32, #tpu.memory_space<vmem>>, vector<1x1x16x256xf32>
    %111 = vector.shape_cast %110 : vector<1x1x16x256xf32> to vector<16x256xf32>
    %112 = arith.subf %111, %89 : vector<16x256xf32>
    %cst_53 = arith.constant 5.000000e-01 : f32
    %113 = vector.broadcast %cst_53 : f32 to vector<16x256xf32>
    %114 = arith.mulf %112, %113 : vector<16x256xf32>
    %115 = arith.addf %89, %114 : vector<16x256xf32>
    %cst_54 = arith.constant 1.000000e+00 : f32
    %116 = vector.broadcast %cst_54 : f32 to vector<16x256xf32>
    %117 = arith.cmpf oge, %115, %116 : vector<16x256xf32>
    %118 = arith.extui %117 : vector<16x256xi1> to vector<16x256xi32>
    %119 = arith.sitofp %118 : vector<16x256xi32> to vector<16x256xf32>
    %cst_55 = arith.constant 1.000000e+00 : f32
    %120 = vector.broadcast %cst_55 : f32 to vector<16x256xf32>
    %121 = arith.subf %120, %119 : vector<16x256xf32>
    %122 = arith.mulf %115, %121 : vector<16x256xf32>
    %cst_56 = arith.constant dense<0.000000e+00> : vector<32x256xf32>
    %123 = tpu.matmul %0, %119, %cst_56 {dimension_numbers = #tpu.dot_dimension_numbers<[1], [0], [0], [1], [0, 0, 1, 1], [], []>} : vector<32x16xf32>, vector<16x256xf32>, vector<32x256xf32> -> vector<32x256xf32>
    %124 = arith.addf %123, %4 : vector<32x256xf32>
    %125 = arith.subf %124, %102 : vector<32x256xf32>
    %cst_57 = arith.constant 5.000000e-01 : f32
    %126 = vector.broadcast %cst_57 : f32 to vector<32x256xf32>
    %127 = arith.mulf %125, %126 : vector<32x256xf32>
    %128 = arith.addf %102, %127 : vector<32x256xf32>
    %cst_58 = arith.constant 1.000000e+00 : f32
    %129 = vector.broadcast %cst_58 : f32 to vector<32x256xf32>
    %130 = arith.cmpf oge, %128, %129 : vector<32x256xf32>
    %131 = arith.extui %130 : vector<32x256xi1> to vector<32x256xi32>
    %132 = arith.sitofp %131 : vector<32x256xi32> to vector<32x256xf32>
    %cst_59 = arith.constant 1.000000e+00 : f32
    %133 = vector.broadcast %cst_59 : f32 to vector<32x256xf32>
    %134 = arith.subf %133, %132 : vector<32x256xf32>
    %135 = arith.mulf %128, %134 : vector<32x256xf32>
    %cst_60 = arith.constant dense<0.000000e+00> : vector<16x256xf32>
    %136 = tpu.matmul %1, %132, %cst_60 {dimension_numbers = #tpu.dot_dimension_numbers<[1], [0], [0], [1], [0, 0, 1, 1], [], []>} : vector<16x32xf32>, vector<32x256xf32>, vector<16x256xf32> -> vector<16x256xf32>
    %137 = arith.addf %136, %7 : vector<16x256xf32>
    %138 = arith.index_cast %c3_i32 : i32 to index
    %c0_61 = arith.constant 0 : index
    %c0_62 = arith.constant 0 : index
    %c0_63 = arith.constant 0 : index
    %139 = vector.load %arg6[%138, %c0_61, %c0_62, %c0_63] : memref<4x1x16x256xf32, #tpu.memory_space<vmem>>, vector<1x1x16x256xf32>
    %140 = vector.shape_cast %139 : vector<1x1x16x256xf32> to vector<16x256xf32>
    %141 = vector.shape_cast %137 : vector<16x256xf32> to vector<1x1x16x256xf32>
    tpu.vector_store %arg6[%138, %c0_61, %c0_62, %c0_63], %141 {strides = array<i32>} : memref<4x1x16x256xf32, #tpu.memory_space<vmem>>, vector<1x1x16x256xf32>,
    %c4_i32 = arith.constant 4 : i32
    return
  }
  func.func @transform_0(%arg0: i32) -> (i32, i32, i32, i32) {
    %c0_i32 = arith.constant 0 : i32
    %c0_i32_0 = arith.constant 0 : i32
    %c0_i32_1 = arith.constant 0 : i32
    %c0_i32_2 = arith.constant 0 : i32
    return %c0_i32, %arg0, %c0_i32_0, %c0_i32_1 : i32, i32, i32, i32
  }
  func.func @transform_1(%arg0: i32) -> (i32, i32) {
    %c0_i32 = arith.constant 0 : i32
    %c0_i32_0 = arith.constant 0 : i32
    %c0_i32_1 = arith.constant 0 : i32
    return %c0_i32, %c0_i32_0 : i32, i32
  }
  func.func @transform_2(%arg0: i32) -> (i32, i32) {
    %c0_i32 = arith.constant 0 : i32
    %c0_i32_0 = arith.constant 0 : i32
    %c0_i32_1 = arith.constant 0 : i32
    return %c0_i32, %c0_i32_0 : i32, i32
  }
  func.func @transform_3(%arg0: i32) -> (i32, i32) {
    %c0_i32 = arith.constant 0 : i32
    %c0_i32_0 = arith.constant 0 : i32
    %c0_i32_1 = arith.constant 0 : i32
    return %c0_i32, %c0_i32_0 : i32, i32
  }
  func.func @transform_4(%arg0: i32) -> (i32, i32) {
    %c0_i32 = arith.constant 0 : i32
    %c0_i32_0 = arith.constant 0 : i32
    %c0_i32_1 = arith.constant 0 : i32
    return %c0_i32, %c0_i32_0 : i32, i32
  }
  func.func @transform_5(%arg0: i32) -> (i32, i32, i32, i32) {
    %c0_i32 = arith.constant 0 : i32
    %c0_i32_0 = arith.constant 0 : i32
    %c0_i32_1 = arith.constant 0 : i32
    %c0_i32_2 = arith.constant 0 : i32
    return %c0_i32, %arg0, %c0_i32_0, %c0_i32_1 : i32, i32, i32, i32
  }
}

</mosaic_0001>

<bundles_post_ra>
// kernel: tpu_custom_call.1
= control target key start
LH: loop header
LB: loop body
LE: loop exit
PB: predicated region body
PF: predicated region fallthrough
CT: control target
= control target key end

     0   :  { %10 = vsyncpa [#allocation3], 0  ;;  %s2521_s0 = inlined_call_operand.hbm [shape: f32[4,2,16,256], index: 0, kind: input, shape index: {}]   ;;  %s2522_s1 = inlined_call_operand.vmem [shape: f32[32,16], index: 1, kind: input, shape index: {}]   ;;  %s2523_s2 = inlined_call_operand.vmem [shape: f32[32,1], index: 2, kind: input, shape index: {}]   ;;  %s2524_s3 = inlined_call_operand.vmem [shape: f32[16,32], index: 3, kind: input, shape index: {}]   ;;  %s2525_s4 = inlined_call_operand.vmem [shape: f32[16,1], index: 4, kind: input, shape index: {}]   ;;  %s2526_s5 = inlined_call_operand.hbm [shape: f32[4,2,16,256], index: 5, kind: output, shape index: {}]  }
   0x1   :  { %12 = vsyncpa [#allocation3 + $0x1], 0 }
   0x2   :  { %13 = vsyncpa [#allocation4], 0 }
   0x3   :  { %15 = vsyncpa [#allocation4 + $0x1], 0  ;;  %s1810_s18 = smov 0   ;;  %s1812_s19 = smov 0  }
   0x4   :  { %s1814_s20 = smov 0   ;;  %s1816_s21 = smov 0  }
   0x5 LB: > { %s1831_s22 = sadd.s32 4294967295, %s1762_s21   ;;  %s1490_s23 = sadd.s32 4294967294, %s1762_s21   ;;  %s1762_s21 = sphi %s1816_s21, %s2534_s21   ;;  %s1758_s20 = sphi %s1814_s20, %s2533_s20   ;;  %s1754_s19 = sphi %s1812_s19, %s2532_s19   ;;  %s1750_s18 = sphi %s1810_s18, %s2531_s18  }
   0x6   : > { %s1835_s24 = sadd.s32 1, %s1762_s21   ;;  %s28_s25 = sadd.s32 1, %s1758_s20 }
   0x7   : > { %s25_s26 = ssub.s32 %s1762_s21, %s1835_s24  ;;  %p35_p0 = scmp.ne.s32.totalorder %s1758_s20, %s1754_s19 }
   0x8   : > { %p26_p1 = scmp.eq.s32.totalorder %s25_s26, 0  ;;  %p36_p2 = scmp.eq.s32.totalorder %s1762_s21, 0 }
   0x9   : > { %p41_p3 = scmp.ne.s32.totalorder %s1754_s19, %s1750_s18  ;;  %p42_p4 = scmp.eq.s32.totalorder %s1831_s22, 0 }
   0xa   : > { %s1847_s27 = scalar_select %p26_p1, %s1758_s20, %s28_s25  }
   0xb   : > { %p1849_p5 = por %p36_p2, %p35_p0  ;;  %p1853_p6 = por %p42_p4, %p41_p3 }
   0xc   : > { %p149_p7 = scmp.eq.s32.totalorder %s1831_s22, 1  ;;  %p155_p8 = scmp.eq.s32.totalorder %s1490_s23, 1 }
   0xd   : > { %p1492_p11 = scmp.ge.s32.totalorder %s1762_s21, 2 }
   0xe   : > { %p1858_p9 = por %p149_p7, %p35_p0  ;;  %p1862_p10 = por %p155_p8, %p41_p3 }
   0xf   : > { %183 = sbr.rel (%p1492_p11) target bundleno = 33 (0x21), region = 32 }
  0x14   : > { %s187_s7 = sand.u32 1, %s1758_s20   ;;  %s1650_s8 = sshll.u32 %s1762_s21, 9 }
  0x15   : > { %s1493_s9 = sshll.u32 %s187_s7, 7  ;;  %s197_s12 = scalar_lea.hbm %s2521_s0, %s1650_s8 }
  0x16   : > { %s1652_s13 = scalar_select %p1849_p5, [#allocation0], [#allocation10] }
  0x17   : > { %s191_s14 = scalar_lea.vmem [#allocation2], %s1493_s9  ;;  %s1764_s17 = smov 1024  }
  0x18   : > { %s210_s15 = sshll.u32 %s191_s14, 4  ;;  %s202_s16 = sld [smem:[%s1652_s13]]   ;;  %s211_s15 = int_to_ptr.vmem [resolvable:$true] %s210_s15 }
  0x19   : > { %1653 = sst [smem:[#allocation7]] (%p1849_p5), %s1764_s17  ;;  %s1765_s23 = smov 512  }
  0x1a   : > { %1654 = sst [smem:[#allocation7 + $0x1]] (%p1849_p5), %s1765_s23  ;;  %s1766_s25 = smov 2  }
  0x1b   : > { %1655 = sst [smem:[#allocation7 + $0x2]] (%p1849_p5), %s1766_s25  ;;  %s1767_s26 = smov 256  }
  0x1c   : > { %1656 = sst [smem:[#allocation7 + $0x3]] (%p1849_p5), %s1767_s26  ;;  %s1768_s9 = smov 16  }
  0x1d   : > { %1657 = sst [smem:[#allocation7 + $0x4]] (%p1849_p5), %s1767_s26  ;;  %s188_s11 = scalar_lea.sflag [#allocation3], %s187_s7 }
  0x1e   : > { %s1496_s8 = sshll.u32 %s202_s16, 26  ;;  %1658 = sst [smem:[#allocation7 + $0x5]] (%p1849_p5), %s1768_s9 }
  0x1f   : > { %s1497_s10 = sadd.s32 134217728, %s1496_s8  ;;  %s1769_s13 = smov 131072  }
  0x20   : > { %1659 = dma.general (%p1849_p5), %s197_s12, 2048, %s211_s15, %s188_s11, %s1769_s13, [#allocation7], %s1497_s10, 0  }
  0x21 PF: > { %p1498_p12 = scmp.ge.s32.totalorder %s1762_s21, 1  ;;  %p231_p13 = scmp.lt.s32.totalorder %s1762_s21, 3 }
  0x23   : > { %p232_p0 = pnand %p1498_p12, %p231_p13 }
  0x24   : > { %s1893_s14 = sand.u32 (!%p232_p0), 1, %s1754_s19  }
  0x25   : > { %235 = sbr.rel (%p232_p0) target bundleno = 1179 (0x49b), region = 40  ;;  %s1499_s16 = sshll.u32 (!%p232_p0), %s1893_s14, 7 }
  0x26   : > { %s238_s17 = scalar_lea.sflag (!%p232_p0), [#allocation3], %s1893_s14  ;;  %s1899_s7 = scalar_lea.vmem (!%p232_p0), [#allocation2], %s1499_s16 }
  0x2a   : > { %1741 = dma.done.wait (%p1853_p6), %s238_s17, 2048  }
  0x2b   : > { %1743 = vsyncadd (%p1853_p6), %s238_s17, 4294965248  ;;  %v1770_v0 = vmov 0.0   ;;  %v1771_v1 = vmov 0   ;;  %v313_v2 = vld [vmem:[%s1899_s7 + $0x18] sm:$0xff]  ;;  %v312_v3 = vld [vmem:[%s1899_s7 + $0x10] sm:$0xff]  ;;  %vm342_vm2 = vcmask 130048  }
  0x2c   : > { %419 = vmatprep.mubr.f32.mxu0 %v1770_v0  ;;  %1723 = vset.pattern.permute.xlu1 %v1771_v1  ;;  %v317_v4 = vmul.f32 0.5, %v313_v2  ;;  %v316_v5 = vmul.f32 0.5, %v312_v3  ;;  %v311_v6 = vld [vmem:[%s1899_s7 + $0x8] sm:$0xff]  ;;  %v310_v7 = vld [vmem:[%s1899_s7] sm:$0xff]  ;;  %v1772_v12 = vmov 1.0   ;;  %v277_v14 = vld [vmem:[%s2523_s2 + $0x18] sm:$0xff] }
  0x2d   : > { %1722 = vset.pattern.permute.xlu0 %v1771_v1  ;;  %571 = vmatprep.mubr.f32.mxu1 %v1770_v0  ;;  %v315_v8 = vmul.f32 0.5, %v311_v6  ;;  %v314_v9 = vmul.f32 0.5, %v310_v7  ;;  %v275_v10 = vld [vmem:[%s2523_s2 + $0x8] sm:$0xff]  ;;  %v1927_v19 = vld [vmem:[%s2522_s1] sm:$0xff]  ;;  %v276_v23 = vld [vmem:[%s2523_s2 + $0x10] sm:$0xff]  ;;  %vm500_vm13 = vcmask 261120  }
  0x2e   : > { %vm325_vm0 = vcmp.ge.f32.partialorder %v317_v4, 1.0  ;;  %vm324_vm1 = vcmp.ge.f32.partialorder %v316_v5, 1.0  ;;  %285 = vperm.xlu1 %1723, %v275_v10   ;;  %v274_v20 = vld [vmem:[%s2523_s2] sm:$0xff]  ;;  %295 = vperm.xlu0 %1722, %v277_v14   ;;  %v1952_v28 = vld [vmem:[%s2522_s1 + $0x8] sm:$0xff]  ;;  %v1966_v31 = vld [vmem:[%s2522_s1 + $0x10] sm:$0xff]  ;;  %s2122_s13 = scalar_lea.vmem [#allocation5], %s1499_s16 }
  0x2f   : > { %v1504_v11 = vsel %vm325_vm0, 1.0, %v1770_v0  ;;  %1505 = vmatprep.subr.msk.mxu0 %vm325_vm0, %v1772_v12  ;;  %v1503_v13 = vsel %vm324_vm1, 1.0, %v1770_v0  ;;  %vm323_vm3 = vcmp.ge.f32.partialorder %v315_v8, 1.0  ;;  %vm322_vm4 = vcmp.ge.f32.partialorder %v314_v9, 1.0  ;;  %v299_v29 = vld [vmem:[%s2525_s4 + $0x8] sm:$0xff]  ;;  %v298_v30 = vld [vmem:[%s2525_s4] sm:$0xff] }
  0x30   : > { %v337_v15 = vsub.f32 1.0, %v1504_v11  ;;  %v336_v16 = vsub.f32 1.0, %v1503_v13  ;;  %1506 = vmatpush1.msk.msra.mxu0 %vm324_vm1, %v1772_v12  ;;  %v1502_v17 = vsel %vm323_vm3, 1.0, %v1770_v0  ;;  %v1501_v18 = vsel %vm322_vm4, 1.0, %v1770_v0  ;;  %v1974_v32 = vld [vmem:[%s2522_s1 + $0x18] sm:$0xff]  ;;  %v1533_v59 = vld [vmem:[%s1899_s7 + $0x30] sm:$0xff] }
  0x31   : > { %v335_v21 = vsub.f32 1.0, %v1502_v17  ;;  %1507 = vmatprep.subr.msk.mxu0 %vm323_vm3, %v1772_v12  ;;  %v334_v22 = vsub.f32 1.0, %v1501_v18  ;;  %v1534_v58 = vld [vmem:[%s1899_s7 + $0x38] sm:$0xff]  ;;  %v1532_v7 = vld [vmem:[%s1899_s7 + $0x28] sm:$0xff]  ;;  %v1531_v10 = vld [vmem:[%s1899_s7 + $0x20] sm:$0xff]  ;;  %s1381_s16 = scalar_lea.sflag [#allocation4], %s1893_s14 }
  0x32   : > { %v1936_v24 = vmul.f32 %v337_v15, %v317_v4  ;;  %v1938_v25 = vmul.f32 %v336_v16, %v316_v5  ;;  %1508 = vmatpush1.msk.msra.mxu0 %vm322_vm4, %v1772_v12  ;;  %280 = vperm.xlu1 %1723, %v274_v20  }
  0x33   : > { %v1942_v26 = vmul.f32 %v335_v21, %v315_v8  ;;  %v1944_v27 = vmul.f32 %v334_v22, %v314_v9  ;;  %1509 = vmatmul.mubr.msk.f32.vlgmr.msra.gmra.mxu0 %vm342_vm2, %v1927_v19  ;;  %290 = vperm.xlu0 %1722, %v276_v23  }
  0x34   : > { %425 = vmatprep.mubr.f32.mxu0 %v1770_v0  ;;  %v596_v8 = vsub.f32 %v1534_v58, %v1936_v24  ;;  %v595_v9 = vsub.f32 %v1533_v59, %v1938_v25 }
  0x35   : > { %v594_v20 = vsub.f32 %v1532_v7, %v1942_v26  ;;  %v593_v21 = vsub.f32 %v1531_v10, %v1944_v27 }
  0x36   : > { %307 = vperm.xlu1 %1723, %v299_v29   ;;  %v600_v23 = vmul.f32 0.5, %v596_v8 }
  0x37   : > { %1510 = vmatmul.mubr.msk.f32.gmra.mxu0 %vm342_vm2, %v1952_v28  ;;  %302 = vperm.xlu0 %1722, %v298_v30  }
  0x38   : > { %431 = vmatprep.mubr.f32.mxu0 %v1770_v0 }
  0x3b   : > { %1511 = vmatmul.mubr.msk.f32.gmra.mxu0 %vm342_vm2, %v1966_v31 }
  0x3c   : > { %437 = vmatprep.mubr.f32.mxu0 %v1770_v0 }
  0x3f   : > { %1512 = vmatmul.mubr.msk.f32.gmra.mxu0 %vm342_vm2, %v1974_v32 }
  0x40   : > { %842 = vmatprep.mubr.f32.mxu0 %v1770_v0 }
  0xa9   : > { %v1979_v33 = vpop.permute.xlu1 %285  ;;  %v1984_v37 = vpop.permute.xlu0 %295 }
  0xad   : > { %v1981_v34 = vpop.permute.xlu1 %280 }
  0xae   : > { %v2000_v49 = vpop.permute.xlu0 %290 }
  0xf3   : > { %v421_v35 = vpop.f32.mrf.mxu0 }
  0xf4   : > { %v422_v36 = vadd.f32 %v421_v35, %v1981_v34 }
  0xf5   : > { %v423_v38 = vpop.f32.mrf.mxu0 }
  0xf6   : > { %v1986_v39 = vmul.f32 0.5, %v422_v36  ;;  %v424_v40 = vadd.f32 %v423_v38, %v1981_v34  ;;  %v599_v36 = vmul.f32 0.5, %v595_v9 }
  0xf7   : > { %v427_v41 = vpop.f32.mrf.mxu0 }
  0xf8   : > { %vm460_vm5 = vcmp.ge.f32.partialorder %v1986_v39, 1.0  ;;  %v1990_v42 = vmul.f32 0.5, %v424_v40  ;;  %v428_v43 = vadd.f32 %v427_v41, %v1979_v33  ;;  %v598_v41 = vmul.f32 0.5, %v594_v20 }
  0xf9   : > { %v1513_v44 = vsel %vm460_vm5, 1.0, %v1770_v0  ;;  %v429_v45 = vpop.f32.mrf.mxu0 }
  0xfa   : > { %v484_v46 = vsub.f32 1.0, %v1513_v44  ;;  %vm461_vm6 = vcmp.ge.f32.partialorder %v1990_v42, 1.0  ;;  %v1997_v47 = vmul.f32 0.5, %v428_v43  ;;  %v430_v48 = vadd.f32 %v429_v45, %v1979_v33 }
  0xfb   : > { %v1514_v50 = vsel %vm461_vm6, 1.0, %v1770_v0  ;;  %v433_v51 = vpop.f32.mrf.mxu0  ;;  %v597_v43 = vmul.f32 0.5, %v593_v21 }
  0xfc   : > { %v2006_v52 = vmul.f32 %v484_v46, %v1986_v39  ;;  %v485_v53 = vsub.f32 1.0, %v1514_v50  ;;  %vm462_vm7 = vcmp.ge.f32.partialorder %v1997_v47, 1.0  ;;  %v447_v54 = vmul.f32 0.5, %v430_v48 }
  0xfd   : > { %v1515_v55 = vsel %vm462_vm7, 1.0, %v1770_v0  ;;  %v434_v56 = vadd.f32 %v433_v51, %v2000_v49  ;;  %v435_v57 = vpop.f32.mrf.mxu0  ;;  %v604_v48 = vadd.f32 %v600_v23, %v1936_v24  ;;  %v2050_v50 = vadd.f32 %v599_v36, %v1938_v25  ;;  %v2072_v24 = vld [vmem:[%s2524_s3] sm:$0xff]  ;;  %v2091_v25 = vld [vmem:[%s2524_s3 + $0x8] sm:$0xff] }
  0xfe   : > { %v2016_v60 = vmul.f32 %v485_v53, %v1990_v42  ;;  %v486_v61 = vsub.f32 1.0, %v1515_v55  ;;  %vm463_vm8 = vcmp.ge.f32.partialorder %v447_v54, 1.0  ;;  %v436_v62 = vadd.f32 %v435_v57, %v2000_v49 }
  0xff   : > { %v1516_v63 = vsel %vm463_vm8, 1.0, %v1770_v0  ;;  %v448_v1 = vmul.f32 0.5, %v434_v56  ;;  %v439_v2 = vpop.f32.mrf.mxu0  ;;  %v2059_v53 = vadd.f32 %v598_v41, %v1942_v26  ;;  %v2064_v55 = vadd.f32 %v597_v43, %v1944_v27  ;;  %v2117_v26 = vpop.permute.xlu0 %302 }
 0x100   : > { %v2022_v3 = vmul.f32 %v486_v61, %v1997_v47  ;;  %v487_v4 = vsub.f32 1.0, %v1516_v63  ;;  %v449_v5 = vmul.f32 0.5, %v436_v62  ;;  %v440_v6 = vadd.f32 %v439_v2, %v1984_v37 }
 0x101   : > { %vm464_vm9 = vcmp.ge.f32.partialorder %v448_v1, 1.0  ;;  %v441_v11 = vpop.f32.mrf.mxu0  ;;  %vm608_vm14 = vcmp.ge.f32.partialorder %v604_v48, 1.0  ;;  %vm607_vm15 = vcmp.ge.f32.partialorder %v2050_v50, 1.0  ;;  %vm606_vm0 = vcmp.ge.f32.partialorder %v2059_v53, 1.0 }
 0x102   : > { %v2029_v13 = vmul.f32 %v487_v4, %v447_v54  ;;  %v1517_v14 = vsel %vm464_vm9, 1.0, %v1770_v0  ;;  %vm465_vm10 = vcmp.ge.f32.partialorder %v449_v5, 1.0  ;;  %v450_v15 = vmul.f32 0.5, %v440_v6  ;;  %v2126_v54 = vpop.permute.xlu1 %307 }
 0x103   : > { %v488_v16 = vsub.f32 1.0, %v1517_v14  ;;  %v1518_v17 = vsel %vm465_vm10, 1.0, %v1770_v0  ;;  %v442_v18 = vadd.f32 %v441_v11, %v1984_v37  ;;  %vm605_vm1 = vcmp.ge.f32.partialorder %v2064_v55, 1.0 }
 0x104   : > { %v489_v22 = vsub.f32 1.0, %v1518_v17  ;;  %vm466_vm11 = vcmp.ge.f32.partialorder %v450_v15, 1.0  ;;  %v1538_v57 = vsel %vm608_vm14, 1.0, %v1770_v0  ;;  %v1535_v6 = vsel %vm605_vm1, 1.0, %v1770_v0  ;;  %v1572_v17 = vld [vmem:[%s1899_s7 + $0x58] sm:$0xff] }
 0x105   : > { %v2038_v29 = vmul.f32 %v488_v16, %v448_v1  ;;  %v451_v30 = vmul.f32 0.5, %v442_v18  ;;  %v1519_v35 = vsel %vm466_vm11, 1.0, %v1770_v0  ;;  %v620_v62 = vsub.f32 1.0, %v1538_v57  ;;  %v1570_v57 = vld [vmem:[%s1899_s7 + $0x48] sm:$0xff] }
 0x106   : > { %v2041_v38 = vmul.f32 %v489_v22, %v449_v5  ;;  %v490_v40 = vsub.f32 1.0, %v1519_v35  ;;  %v1537_v1 = vsel %vm607_vm15, 1.0, %v1770_v0  ;;  %v1536_v5 = vsel %vm606_vm0, 1.0, %v1770_v0 }
 0x107   : > { %vm467_vm12 = vcmp.ge.f32.partialorder %v451_v30, 1.0  ;;  %v2147_v9 = vmul.f32 %v620_v62, %v604_v48  ;;  %v619_v10 = vsub.f32 1.0, %v1537_v1  ;;  %v618_v18 = vsub.f32 1.0, %v1536_v5  ;;  %v1571_v48 = vld [vmem:[%s1899_s7 + $0x50] sm:$0xff] }
 0x108   : > { %v1520_v44 = vsel %vm467_vm12, 1.0, %v1770_v0  ;;  %1521 = vmatprep.subr.msk.mxu1 %vm467_vm12, %v1772_v12  ;;  %v2045_v45 = vmul.f32 %v490_v40, %v450_v15  ;;  %v617_v20 = vsub.f32 1.0, %v1535_v6 }
 0x109   : > { %v491_v46 = vsub.f32 1.0, %v1520_v44  ;;  %1522 = vmatpush1.msk.msra.mxu1 %vm466_vm11, %v1772_v12  ;;  %v2158_v36 = vmul.f32 %v619_v10, %v2050_v50  ;;  %v868_v41 = vsub.f32 %v1572_v17, %v2147_v9 }
 0x10a   : > { %1523 = vmatprep.subr.msk.mxu1 %vm465_vm10, %v1772_v12 }
 0x10b   : > { %v2054_v51 = vmul.f32 %v491_v46, %v451_v30  ;;  %1524 = vmatpush1.msk.msra.mxu1 %vm464_vm9, %v1772_v12 }
 0x10c   : > { %1525 = vmatprep.subr.msk.mxu1 %vm463_vm8, %v1772_v12 }
 0x10d   : > { %1526 = vmatpush1.msk.msra.mxu1 %vm462_vm7, %v1772_v12 }
 0x10e   : > { %1527 = vmatprep.subr.msk.mxu1 %vm461_vm6, %v1772_v12 }
 0x10f   : > { %1528 = vmatpush1.msk.msra.mxu1 %vm460_vm5, %v1772_v12 }
 0x110   : > { %1529 = vmatmul.mubr.msk.f32.vlgmr.msra.gmra.mxu1 %vm500_vm13, %v2072_v24  ;;  %1539 = vmatprep.subr.msk.mxu1 %vm608_vm14, %v1772_v12 }
 0x111   : > { %577 = vmatprep.mubr.f32.mxu1 %v1770_v0  ;;  %1540 = vmatpush1.msk.msra.mxu1 %vm607_vm15, %v1772_v12 }
 0x112   : > { %1541 = vmatprep.subr.msk.mxu1 %vm606_vm0, %v1772_v12 }
 0x113   : > { %1542 = vmatpush1.msk.msra.mxu1 %vm605_vm1, %v1772_v12 }
 0x114   : > { %1530 = vmatmul.mubr.msk.f32.gmra.mxu1 %vm500_vm13, %v2091_v25 }
 0x115   : > { %689 = vmatprep.mubr.f32.mxu1 %v1770_v0 }
 0x118   : > { %1543 = vmatmul.mubr.msk.f32.vlgmr.msra.gmra.mxu1 %vm342_vm2, %v1927_v19 }
 0x119   : > { %695 = vmatprep.mubr.f32.mxu1 %v1770_v0 }
 0x11c   : > { %1544 = vmatmul.mubr.msk.f32.gmra.mxu1 %vm342_vm2, %v1952_v28 }
 0x11d   : > { %701 = vmatprep.mubr.f32.mxu1 %v1770_v0 }
 0x120   : > { %1545 = vmatmul.mubr.msk.f32.gmra.mxu1 %vm342_vm2, %v1966_v31 }
 0x121   : > { %707 = vmatprep.mubr.f32.mxu1 %v1770_v0 }
 0x124   : > { %1546 = vmatmul.mubr.msk.f32.gmra.mxu1 %vm342_vm2, %v1974_v32 }
 0x125   : > { %1114 = vmatprep.mubr.f32.mxu1 %v1770_v0 }
 0x1d0   : > { %v573_v27 = vpop.f32.mrf.mxu1 }
 0x1d1   : > { %v574_v39 = vadd.f32 %v573_v27, %v2117_v26  ;;  %v2168_v27 = vmul.f32 %v618_v18, %v2059_v53  ;;  %v872_v53 = vmul.f32 0.5, %v868_v41 }
 0x1d2   : > { %v575_v42 = vpop.f32.mrf.mxu1 }
 0x1d3   : > { %584 = vst [vmem:[%s2122_s13] sm:$0xff] %v574_v39  ;;  %v576_v47 = vadd.f32 %v575_v42, %v2117_v26  ;;  %v2171_v39 = vmul.f32 %v617_v20, %v2064_v55 }
 0x1d4   : > { %v579_v56 = vpop.f32.mrf.mxu1 }
 0x1d5   : > { %585 = vst [vmem:[%s2122_s13 + $0x8] sm:$0xff] %v576_v47  ;;  %v580_v58 = vadd.f32 %v579_v56, %v2126_v54 }
 0x1d6   : > { %v581_v59 = vpop.f32.mrf.mxu1 }
 0x1d7   : > { %586 = vst [vmem:[%s2122_s13 + $0x10] sm:$0xff] %v580_v58  ;;  %v582_v61 = vadd.f32 %v581_v59, %v2126_v54  ;;  %v867_v59 = vsub.f32 %v1571_v48, %v2158_v36 }
 0x1d8   : > { %v691_v63 = vpop.f32.mrf.mxu1 }
 0x1d9   : > { %587 = vst [vmem:[%s2122_s13 + $0x18] sm:$0xff] %v582_v61  ;;  %v692_v2 = vadd.f32 %v691_v63, %v1981_v34 }
 0x1da   : > { %v693_v4 = vpop.f32.mrf.mxu1 }
 0x1db   : > { %v714_v7 = vsub.f32 %v692_v2, %v2006_v52  ;;  %v694_v8 = vadd.f32 %v693_v4, %v1981_v34  ;;  %v866_v4 = vsub.f32 %v1570_v57, %v2168_v27 }
 0x1dc   : > { %v697_v11 = vpop.f32.mrf.mxu1 }
 0x1dd   : > { %v722_v14 = vmul.f32 0.5, %v714_v7  ;;  %v715_v15 = vsub.f32 %v694_v8, %v2016_v60  ;;  %v698_v16 = vadd.f32 %v697_v11, %v1979_v33 }
 0x1de   : > { %v699_v21 = vpop.f32.mrf.mxu1 }
 0x1df   : > { %v2153_v22 = vadd.f32 %v722_v14, %v2006_v52  ;;  %v723_v23 = vmul.f32 0.5, %v715_v15  ;;  %v716_v30 = vsub.f32 %v698_v16, %v2022_v3  ;;  %v700_v35 = vadd.f32 %v699_v21, %v1979_v33 }
 0x1e0   : > { %v703_v40 = vpop.f32.mrf.mxu1 }
 0x1e1   : > { %v2162_v43 = vadd.f32 %v723_v23, %v2016_v60  ;;  %v724_v44 = vmul.f32 0.5, %v716_v30  ;;  %v717_v46 = vsub.f32 %v700_v35, %v2029_v13  ;;  %v704_v52 = vadd.f32 %v703_v40, %v2000_v49 }
 0x1e2   : > { %v705_v50 = vpop.f32.mrf.mxu1  ;;  %vm738_vm3 = vcmp.ge.f32.partialorder %v2153_v22, 1.0 }
 0x1e3   : > { %v2175_v42 = vadd.f32 %v724_v44, %v2022_v3  ;;  %v725_v60 = vmul.f32 0.5, %v717_v46  ;;  %v718_v47 = vsub.f32 %v704_v52, %v2038_v29  ;;  %v706_v56 = vadd.f32 %v705_v50, %v2000_v49 }
 0x1e4   : > { %v709_v58 = vpop.f32.mrf.mxu1  ;;  %vm739_vm4 = vcmp.ge.f32.partialorder %v2162_v43, 1.0  ;;  %v1547_v55 = vsel %vm738_vm3, 1.0, %v1770_v0 }
 0x1e5   : > { %v733_v61 = vadd.f32 %v725_v60, %v2029_v13  ;;  %v726_v3 = vmul.f32 0.5, %v718_v47  ;;  %v719_v62 = vsub.f32 %v706_v56, %v2041_v38  ;;  %v710_v63 = vadd.f32 %v709_v58, %v1984_v37 }
 0x1e6   : > { %v711_v1 = vpop.f32.mrf.mxu1  ;;  %vm740_vm5 = vcmp.ge.f32.partialorder %v2175_v42, 1.0  ;;  %v1548_v2 = vsel %vm739_vm4, 1.0, %v1770_v0  ;;  %v762_v5 = vsub.f32 1.0, %v1547_v55  ;;  %v871_v60 = vmul.f32 0.5, %v867_v59 }
 0x1e7   : > { %v734_v6 = vadd.f32 %v726_v3, %v2038_v29  ;;  %v727_v7 = vmul.f32 0.5, %v719_v62  ;;  %v720_v13 = vsub.f32 %v710_v63, %v2045_v45  ;;  %v712_v8 = vadd.f32 %v711_v1, %v1984_v37  ;;  %v1569_v29 = vld [vmem:[%s1899_s7 + $0x40] sm:$0xff] }
 0x1e8   : > { %vm741_vm6 = vcmp.ge.f32.partialorder %v733_v61, 1.0  ;;  %v763_v10 = vsub.f32 1.0, %v1548_v2  ;;  %v2197_v11 = vmul.f32 %v762_v5, %v2153_v22  ;;  %v1549_v14 = vsel %vm740_vm5, 1.0, %v1770_v0 }
 0x1e9   : > { %v735_v15 = vadd.f32 %v727_v7, %v2041_v38  ;;  %v728_v16 = vmul.f32 0.5, %v720_v13  ;;  %v721_v17 = vsub.f32 %v712_v8, %v2054_v51  ;;  %vm742_vm7 = vcmp.ge.f32.partialorder %v734_v6, 1.0 }
 0x1ea   : > { %v1550_v18 = vsel %vm741_vm6, 1.0, %v1770_v0  ;;  %v2208_v20 = vmul.f32 %v763_v10, %v2162_v43  ;;  %v764_v21 = vsub.f32 1.0, %v1549_v14  ;;  %v1551_v23 = vsel %vm742_vm7, 1.0, %v1770_v0 }
 0x1eb   : > { %v736_v30 = vadd.f32 %v728_v16, %v2045_v45  ;;  %v729_v35 = vmul.f32 0.5, %v721_v17  ;;  %vm743_vm8 = vcmp.ge.f32.partialorder %v735_v15, 1.0  ;;  %v765_v38 = vsub.f32 1.0, %v1550_v18 }
 0x1ec   : > { %v1552_v40 = vsel %vm743_vm8, 1.0, %v1770_v0  ;;  %v865_v41 = vsub.f32 %v1569_v29, %v2171_v39  ;;  %v2217_v44 = vmul.f32 %v764_v21, %v2175_v42  ;;  %v766_v46 = vsub.f32 1.0, %v1551_v23 }
 0x1ed   : > { %v737_v52 = vadd.f32 %v729_v35, %v2054_v51  ;;  %vm744_vm9 = vcmp.ge.f32.partialorder %v736_v30, 1.0  ;;  %v767_v48 = vsub.f32 1.0, %v1552_v40  ;;  %v2220_v50 = vmul.f32 %v765_v38, %v733_v61  ;;  %v1610_v35 = vld [vmem:[%s1899_s7 + $0x78] sm:$0xff] }
 0x1ee   : > { %v2222_v45 = vmul.f32 %v766_v46, %v734_v6  ;;  %v1553_v47 = vsel %vm744_vm9, 1.0, %v1770_v0  ;;  %v870_v56 = vmul.f32 0.5, %v866_v4  ;;  %v869_v3 = vmul.f32 0.5, %v865_v41 }
 0x1ef   : > { %vm745_vm10 = vcmp.ge.f32.partialorder %v737_v52, 1.0  ;;  %v2225_v57 = vmul.f32 %v767_v48, %v735_v15  ;;  %v768_v58 = vsub.f32 1.0, %v1553_v47  ;;  %v876_v62 = vadd.f32 %v872_v53, %v2147_v9  ;;  %v1609_v47 = vld [vmem:[%s1899_s7 + $0x70] sm:$0xff] }
 0x1f0   : > { %v1554_v55 = vsel %vm745_vm10, 1.0, %v1770_v0  ;;  %1555 = vmatprep.subr.msk.mxu0 %vm745_vm10, %v1772_v12  ;;  %v875_v63 = vadd.f32 %v871_v60, %v2158_v36  ;;  %v2239_v1 = vadd.f32 %v870_v56, %v2168_v27  ;;  %v2246_v9 = vadd.f32 %v869_v3, %v2171_v39 }
 0x1f1   : > { %v769_v51 = vsub.f32 1.0, %v1554_v55  ;;  %1556 = vmatpush1.msk.msra.mxu0 %vm744_vm9, %v1772_v12  ;;  %v2231_v59 = vmul.f32 %v768_v58, %v736_v30  ;;  %vm880_vm11 = vcmp.ge.f32.partialorder %v876_v62, 1.0 }
 0x1f2   : > { %1557 = vmatprep.subr.msk.mxu0 %vm743_vm8, %v1772_v12  ;;  %vm879_vm12 = vcmp.ge.f32.partialorder %v875_v63, 1.0  ;;  %vm878_vm14 = vcmp.ge.f32.partialorder %v2239_v1, 1.0  ;;  %vm877_vm15 = vcmp.ge.f32.partialorder %v2246_v9, 1.0  ;;  %v1576_v42 = vsel %vm880_vm11, 1.0, %v1770_v0 }
 0x1f3   : > { %1558 = vmatpush1.msk.msra.mxu0 %vm742_vm7, %v1772_v12  ;;  %v2241_v2 = vmul.f32 %v769_v51, %v737_v52  ;;  %v1575_v4 = vsel %vm879_vm12, 1.0, %v1770_v0  ;;  %v892_v6 = vsub.f32 1.0, %v1576_v42  ;;  %v1574_v14 = vsel %vm878_vm14, 1.0, %v1770_v0  ;;  %v1608_v42 = vld [vmem:[%s1899_s7 + $0x68] sm:$0xff] }
 0x1f4   : > { %1559 = vmatprep.subr.msk.mxu0 %vm741_vm6, %v1772_v12  ;;  %v891_v8 = vsub.f32 1.0, %v1575_v4  ;;  %v1573_v18 = vsel %vm877_vm15, 1.0, %v1770_v0  ;;  %v890_v38 = vsub.f32 1.0, %v1574_v14 }
 0x1f5   : > { %1560 = vmatpush1.msk.msra.mxu0 %vm740_vm5, %v1772_v12  ;;  %v2305_v29 = vmul.f32 %v892_v6, %v876_v62  ;;  %v889_v56 = vsub.f32 1.0, %v1573_v18 }
 0x1f6   : > { %1561 = vmatprep.subr.msk.mxu0 %vm739_vm4, %v1772_v12  ;;  %v2313_v41 = vmul.f32 %v891_v8, %v875_v63 }
 0x1f7   : > { %1562 = vmatpush1.msk.msra.mxu0 %vm738_vm3, %v1772_v12  ;;  %v1140_v55 = vsub.f32 %v1610_v35, %v2305_v29  ;;  %v893_v4 = vmul.f32 %v889_v56, %v2246_v9 }
 0x1f8   : > { %1563 = vmatmul.mubr.msk.f32.vlgmr.msra.gmra.mxu0 %vm500_vm13, %v2072_v24  ;;  %1577 = vmatprep.subr.msk.mxu0 %vm880_vm11, %v1772_v12 }
 0x1f9   : > { %848 = vmatprep.mubr.f32.mxu0 %v1770_v0  ;;  %1578 = vmatpush1.msk.msra.mxu0 %vm879_vm12, %v1772_v12 }
 0x1fa   : > { %1579 = vmatprep.subr.msk.mxu0 %vm878_vm14, %v1772_v12 }
 0x1fb   : > { %1580 = vmatpush1.msk.msra.mxu0 %vm877_vm15, %v1772_v12 }
 0x1fc   : > { %1564 = vmatmul.mubr.msk.f32.gmra.mxu0 %vm500_vm13, %v2091_v25 }
 0x1fd   : > { %961 = vmatprep.mubr.f32.mxu0 %v1770_v0 }
 0x200   : > { %1581 = vmatmul.mubr.msk.f32.vlgmr.msra.gmra.mxu0 %vm342_vm2, %v1927_v19 }
 0x201   : > { %967 = vmatprep.mubr.f32.mxu0 %v1770_v0 }
 0x204   : > { %1582 = vmatmul.mubr.msk.f32.gmra.mxu0 %vm342_vm2, %v1952_v28 }
 0x205   : > { %973 = vmatprep.mubr.f32.mxu0 %v1770_v0 }
 0x208   : > { %1583 = vmatmul.mubr.msk.f32.gmra.mxu0 %vm342_vm2, %v1966_v31 }
 0x209   : > { %979 = vmatprep.mubr.f32.mxu0 %v1770_v0 }
 0x20c   : > { %1584 = vmatmul.mubr.msk.f32.gmra.mxu0 %vm342_vm2, %v1974_v32 }
 0x20d   : > { %1362 = vmatprep.mubr.f32.mxu0 %v1770_v0 }
 0x2b8   : > { %v844_v22 = vpop.f32.mrf.mxu0 }
 0x2b9   : > { %v845_v36 = vadd.f32 %v844_v22, %v2117_v26  ;;  %v1139_v22 = vsub.f32 %v1609_v47, %v2313_v41 }
 0x2ba   : > { %v846_v43 = vpop.f32.mrf.mxu0 }
 0x2bb   : > { %1565 = vst [vmem:[%s2122_s13 + $0x20] sm:$0xff] %v845_v36  ;;  %v847_v27 = vadd.f32 %v846_v43, %v2117_v26  ;;  %v2330_v36 = vmul.f32 %v890_v38, %v2239_v1 }
 0x2bc   : > { %v850_v39 = vpop.f32.mrf.mxu0 }
 0x2bd   : > { %1566 = vst [vmem:[%s2122_s13 + $0x28] sm:$0xff] %v847_v27  ;;  %v851_v53 = vadd.f32 %v850_v39, %v2126_v54  ;;  %v1138_v9 = vsub.f32 %v1608_v42, %v2330_v36 }
 0x2be   : > { %v852_v61 = vpop.f32.mrf.mxu0 }
 0x2bf   : > { %1567 = vst [vmem:[%s2122_s13 + $0x30] sm:$0xff] %v851_v53  ;;  %v853_v5 = vadd.f32 %v852_v61, %v2126_v54  ;;  %v1144_v61 = vmul.f32 0.5, %v1140_v55 }
 0x2c0   : > { %v963_v7 = vpop.f32.mrf.mxu0 }
 0x2c1   : > { %1568 = vst [vmem:[%s2122_s13 + $0x38] sm:$0xff] %v853_v5  ;;  %v964_v13 = vadd.f32 %v963_v7, %v1981_v34 }
 0x2c2   : > { %v965_v10 = vpop.f32.mrf.mxu0 }
 0x2c3   : > { %v986_v15 = vsub.f32 %v964_v13, %v2197_v11  ;;  %v966_v16 = vadd.f32 %v965_v10, %v1981_v34 }
 0x2c4   : > { %v969_v17 = vpop.f32.mrf.mxu0 }
 0x2c5   : > { %v994_v21 = vmul.f32 0.5, %v986_v15  ;;  %v987_v23 = vsub.f32 %v966_v16, %v2208_v20  ;;  %v970_v30 = vadd.f32 %v969_v17, %v1979_v33 }
 0x2c6   : > { %v971_v40 = vpop.f32.mrf.mxu0 }
 0x2c7   : > { %v2316_v46 = vadd.f32 %v994_v21, %v2197_v11  ;;  %v995_v52 = vmul.f32 0.5, %v987_v23  ;;  %v988_v48 = vsub.f32 %v970_v30, %v2217_v44  ;;  %v972_v60 = vadd.f32 %v971_v40, %v1979_v33 }
 0x2c8   : > { %v975_v58 = vpop.f32.mrf.mxu0 }
 0x2c9   : > { %v2323_v3 = vadd.f32 %v995_v52, %v2208_v20  ;;  %v996_v51 = vmul.f32 0.5, %v988_v48  ;;  %v989_v62 = vsub.f32 %v972_v60, %v2220_v50  ;;  %v976_v11 = vadd.f32 %v975_v58, %v2000_v49 }
 0x2ca   : > { %v977_v63 = vpop.f32.mrf.mxu0  ;;  %vm1010_vm0 = vcmp.ge.f32.partialorder %v2316_v46, 1.0 }
 0x2cb   : > { %v2333_v43 = vadd.f32 %v996_v51, %v2217_v44  ;;  %v997_v27 = vmul.f32 0.5, %v989_v62  ;;  %v990_v20 = vsub.f32 %v976_v11, %v2222_v45  ;;  %v978_v39 = vadd.f32 %v977_v63, %v2000_v49 }
 0x2cc   : > { %v981_v53 = vpop.f32.mrf.mxu0  ;;  %vm1011_vm1 = vcmp.ge.f32.partialorder %v2323_v3, 1.0  ;;  %v1585_v1 = vsel %vm1010_vm0, 1.0, %v1770_v0 }
 0x2cd   : > { %v1005_v5 = vadd.f32 %v997_v27, %v2220_v50  ;;  %v998_v44 = vmul.f32 0.5, %v990_v20  ;;  %v991_v6 = vsub.f32 %v978_v39, %v2225_v57  ;;  %v982_v7 = vadd.f32 %v981_v53, %v1984_v37 }
 0x2ce   : > { %v983_v13 = vpop.f32.mrf.mxu0  ;;  %vm1012_vm3 = vcmp.ge.f32.partialorder %v2333_v43, 1.0  ;;  %v1586_v8 = vsel %vm1011_vm1, 1.0, %v1770_v0  ;;  %v1034_v10 = vsub.f32 1.0, %v1585_v1  ;;  %v1143_v27 = vmul.f32 0.5, %v1139_v22 }
 0x2cf   : > { %v1006_v14 = vadd.f32 %v998_v44, %v2222_v45  ;;  %v999_v15 = vmul.f32 0.5, %v991_v6  ;;  %v992_v50 = vsub.f32 %v982_v7, %v2231_v59  ;;  %v984_v16 = vadd.f32 %v983_v13, %v1984_v37  ;;  %v1607_v45 = vld [vmem:[%s1899_s7 + $0x60] sm:$0xff] }
 0x2d0   : > { %vm1013_vm4 = vcmp.ge.f32.partialorder %v1005_v5, 1.0  ;;  %v1035_v17 = vsub.f32 1.0, %v1586_v8  ;;  %v2355_v18 = vmul.f32 %v1034_v10, %v2316_v46  ;;  %v1587_v21 = vsel %vm1012_vm3, 1.0, %v1770_v0 }
 0x2d1   : > { %v1007_v23 = vadd.f32 %v999_v15, %v2225_v57  ;;  %v1000_v30 = vmul.f32 0.5, %v992_v50  ;;  %v993_v35 = vsub.f32 %v984_v16, %v2241_v2  ;;  %vm1014_vm5 = vcmp.ge.f32.partialorder %v1006_v14, 1.0 }
 0x2d2   : > { %v1588_v38 = vsel %vm1013_vm4, 1.0, %v1770_v0  ;;  %v2366_v40 = vmul.f32 %v1035_v17, %v2323_v3  ;;  %v1036_v52 = vsub.f32 1.0, %v1587_v21  ;;  %v1589_v48 = vsel %vm1014_vm5, 1.0, %v1770_v0 }
 0x2d3   : > { %v1008_v60 = vadd.f32 %v1000_v30, %v2231_v59  ;;  %v1001_v47 = vmul.f32 0.5, %v993_v35  ;;  %vm1015_vm6 = vcmp.ge.f32.partialorder %v1007_v23, 1.0  ;;  %v1037_v57 = vsub.f32 1.0, %v1588_v38 }
 0x2d4   : > { %v1590_v56 = vsel %vm1015_vm6, 1.0, %v1770_v0  ;;  %v1137_v58 = vsub.f32 %v1607_v45, %v893_v4  ;;  %v2374_v55 = vmul.f32 %v1036_v52, %v2333_v43  ;;  %v1038_v51 = vsub.f32 1.0, %v1589_v48 }
 0x2d5   : > { %v1009_v62 = vadd.f32 %v1001_v47, %v2241_v2  ;;  %vm1016_vm7 = vcmp.ge.f32.partialorder %v1008_v60, 1.0  ;;  %v1039_v11 = vsub.f32 1.0, %v1590_v56  ;;  %v2377_v63 = vmul.f32 %v1037_v57, %v1005_v5 }
 0x2d6   : > { %v2379_v20 = vmul.f32 %v1038_v51, %v1006_v14  ;;  %v1591_v59 = vsel %vm1016_vm7, 1.0, %v1770_v0  ;;  %v1142_v39 = vmul.f32 0.5, %v1138_v9  ;;  %v1141_v44 = vmul.f32 0.5, %v1137_v58 }
 0x2d7   : > { %vm1017_vm8 = vcmp.ge.f32.partialorder %v1009_v62, 1.0  ;;  %v2382_v42 = vmul.f32 %v1039_v11, %v1007_v23  ;;  %v1040_v53 = vsub.f32 1.0, %v1591_v59  ;;  %v1148_v6 = vadd.f32 %v1144_v61, %v2305_v29 }
 0x2d8   : > { %v1592_v1 = vsel %vm1017_vm8, 1.0, %v1770_v0  ;;  %1593 = vmatprep.subr.msk.mxu1 %vm1017_vm8, %v1772_v12  ;;  %v1147_v7 = vadd.f32 %v1143_v27, %v2313_v41  ;;  %v1146_v13 = vadd.f32 %v1142_v39, %v2330_v36  ;;  %v1145_v9 = vadd.f32 %v1141_v44, %v893_v4 }
 0x2d9   : > { %v1041_v2 = vsub.f32 1.0, %v1592_v1  ;;  %1594 = vmatpush1.msk.msra.mxu1 %vm1016_vm7, %v1772_v12  ;;  %v2388_v22 = vmul.f32 %v1040_v53, %v1008_v60  ;;  %vm1152_vm9 = vcmp.ge.f32.partialorder %v1148_v6, 1.0 }
 0x2da   : > { %1595 = vmatprep.subr.msk.mxu1 %vm1015_vm6, %v1772_v12  ;;  %vm1151_vm10 = vcmp.ge.f32.partialorder %v1147_v7, 1.0  ;;  %vm1150_vm11 = vcmp.ge.f32.partialorder %v1146_v13, 1.0  ;;  %vm1149_vm12 = vcmp.ge.f32.partialorder %v1145_v9, 1.0 }
 0x2db   : > { %1596 = vmatpush1.msk.msra.mxu1 %vm1014_vm5, %v1772_v12  ;;  %v2396_v8 = vmul.f32 %v1041_v2, %v1009_v62 }
 0x2dc   : > { %1597 = vmatprep.subr.msk.mxu1 %vm1013_vm4, %v1772_v12 }
 0x2dd   : > { %1598 = vmatpush1.msk.msra.mxu1 %vm1012_vm3, %v1772_v12 }
 0x2de   : > { %1599 = vmatprep.subr.msk.mxu1 %vm1011_vm1, %v1772_v12 }
 0x2df   : > { %1600 = vmatpush1.msk.msra.mxu1 %vm1010_vm0, %v1772_v12 }
 0x2e0   : > { %1601 = vmatmul.mubr.msk.f32.vlgmr.msra.gmra.mxu1 %vm500_vm13, %v2072_v24  ;;  %1615 = vmatprep.subr.msk.mxu1 %vm1152_vm9, %v1772_v12 }
 0x2e1   : > { %1120 = vmatprep.mubr.f32.mxu1 %v1770_v0  ;;  %1616 = vmatpush1.msk.msra.mxu1 %vm1151_vm10, %v1772_v12 }
 0x2e2   : > { %1617 = vmatprep.subr.msk.mxu1 %vm1150_vm11, %v1772_v12 }
 0x2e3   : > { %1618 = vmatpush1.msk.msra.mxu1 %vm1149_vm12, %v1772_v12 }
 0x2e4   : > { %1602 = vmatmul.mubr.msk.f32.gmra.mxu1 %vm500_vm13, %v2091_v25 }
 0x2e5   : > { %1225 = vmatprep.mubr.f32.mxu1 %v1770_v0 }
 0x2e8   : > { %1619 = vmatmul.mubr.msk.f32.vlgmr.msra.gmra.mxu1 %vm342_vm2, %v1927_v19 }
 0x2e9   : > { %1231 = vmatprep.mubr.f32.mxu1 %v1770_v0 }
 0x2ec   : > { %1620 = vmatmul.mubr.msk.f32.gmra.mxu1 %vm342_vm2, %v1952_v28 }
 0x2ed   : > { %1237 = vmatprep.mubr.f32.mxu1 %v1770_v0 }
 0x2f0   : > { %1621 = vmatmul.mubr.msk.f32.gmra.mxu1 %vm342_vm2, %v1966_v31 }
 0x2f1   : > { %1243 = vmatprep.mubr.f32.mxu1 %v1770_v0 }
 0x2f4   : > { %1622 = vmatmul.mubr.msk.f32.gmra.mxu1 %vm342_vm2, %v1974_v32 }
 0x3a0   : > { %v1116_v29 = vpop.f32.mrf.mxu1 }
 0x3a1   : > { %v1117_v19 = vadd.f32 %v1116_v29, %v2117_v26 }
 0x3a2   : > { %v1118_v41 = vpop.f32.mrf.mxu1 }
 0x3a3   : > { %1603 = vst [vmem:[%s2122_s13 + $0x40] sm:$0xff] %v1117_v19  ;;  %v1119_v46 = vadd.f32 %v1118_v41, %v2117_v26 }
 0x3a4   : > { %v1122_v3 = vpop.f32.mrf.mxu1 }
 0x3a5   : > { %1604 = vst [vmem:[%s2122_s13 + $0x48] sm:$0xff] %v1119_v46  ;;  %v1123_v28 = vadd.f32 %v1122_v3, %v2126_v54 }
 0x3a6   : > { %v1124_v36 = vpop.f32.mrf.mxu1 }
 0x3a7   : > { %1605 = vst [vmem:[%s2122_s13 + $0x50] sm:$0xff] %v1123_v28  ;;  %v1125_v31 = vadd.f32 %v1124_v36, %v2126_v54 }
 0x3a8   : > { %v1227_v43 = vpop.f32.mrf.mxu1 }
 0x3a9   : > { %1606 = vst [vmem:[%s2122_s13 + $0x58] sm:$0xff] %v1125_v31  ;;  %v1228_v35 = vadd.f32 %v1227_v43, %v1981_v34 }
 0x3aa   : > { %v1229_v61 = vpop.f32.mrf.mxu1 }
 0x3ab   : > { %v1230_v21 = vadd.f32 %v1229_v61, %v1981_v34  ;;  %v1250_v58 = vsub.f32 %v1228_v35, %v2355_v18 }
 0x3ac   : > { %v1233_v4 = vpop.f32.mrf.mxu1 }
 0x3ad   : > { %v1234_v16 = vadd.f32 %v1233_v4, %v1979_v33  ;;  %v1251_v60 = vsub.f32 %v1230_v21, %v2366_v40  ;;  %v1258_v53 = vmul.f32 0.5, %v1250_v58 }
 0x3ae   : > { %v1235_v32 = vpop.f32.mrf.mxu1 }
 0x3af   : > { %v1236_v15 = vadd.f32 %v1235_v32, %v1979_v33  ;;  %v1252_v33 = vsub.f32 %v1234_v16, %v2374_v55  ;;  %v1259_v59 = vmul.f32 0.5, %v1251_v60 }
 0x3b0   : > { %v1239_v5 = vpop.f32.mrf.mxu1 }
 0x3b1   : > { %v1240_v10 = vadd.f32 %v1239_v5, %v2000_v49  ;;  %v1253_v52 = vsub.f32 %v1236_v15, %v2377_v63  ;;  %v1260_v11 = vmul.f32 0.5, %v1252_v33  ;;  %v1267_v6 = vadd.f32 %v1259_v59, %v2366_v40 }
 0x3b2   : > { %v1241_v14 = vpop.f32.mrf.mxu1 }
 0x3b3   : > { %v1242_v50 = vadd.f32 %v1241_v14, %v2000_v49  ;;  %v1254_v45 = vsub.f32 %v1240_v10, %v2379_v20  ;;  %v1261_v51 = vmul.f32 0.5, %v1253_v52  ;;  %v1268_v2 = vadd.f32 %v1260_v11, %v2374_v55 }
 0x3b4   : > { %v1245_v17 = vpop.f32.mrf.mxu1  ;;  %vm1275_vm4 = vcmp.ge.f32.partialorder %v1267_v6, 1.0 }
 0x3b5   : > { %v1255_v23 = vsub.f32 %v1242_v50, %v2382_v42  ;;  %v1246_v30 = vadd.f32 %v1245_v17, %v1984_v37  ;;  %v1262_v34 = vmul.f32 0.5, %v1254_v45  ;;  %v1269_v44 = vadd.f32 %v1261_v51, %v2377_v63 }
 0x3b6   : > { %v1247_v38 = vpop.f32.mrf.mxu1  ;;  %vm1276_vm3 = vcmp.ge.f32.partialorder %v1268_v2, 1.0 }
 0x3b7   : > { %v1256_v48 = vsub.f32 %v1246_v30, %v2388_v22  ;;  %v1248_v49 = vadd.f32 %v1247_v38, %v1984_v37  ;;  %v1263_v47 = vmul.f32 0.5, %v1255_v23  ;;  %v1270_v1 = vadd.f32 %v1262_v34, %v2379_v20 }
 0x3b8   : > { %vm1277_vm1 = vcmp.ge.f32.partialorder %v1269_v44, 1.0 }
 0x3b9   : > { %v1264_v57 = vmul.f32 0.5, %v1256_v48  ;;  %v1257_v56 = vsub.f32 %v1248_v49, %v2396_v8  ;;  %v1271_v37 = vadd.f32 %v1263_v47, %v2382_v42  ;;  %vm1278_vm0 = vcmp.ge.f32.partialorder %v1270_v1, 1.0 }
 0x3bb   : > { %v1265_v62 = vmul.f32 0.5, %v1257_v56  ;;  %v1272_v27 = vadd.f32 %v1264_v57, %v2388_v22  ;;  %vm1279_vm15 = vcmp.ge.f32.partialorder %v1271_v37, 1.0  ;;  %v1266_v22 = vadd.f32 %v1258_v53, %v2355_v18 }
 0x3bd   : > { %v1273_v39 = vadd.f32 %v1265_v62, %v2396_v8  ;;  %vm1280_vm14 = vcmp.ge.f32.partialorder %v1272_v27, 1.0  ;;  %vm1274_vm5 = vcmp.ge.f32.partialorder %v1266_v22, 1.0 }
 0x3bf   : > { %vm1281_vm2 = vcmp.ge.f32.partialorder %v1273_v39, 1.0 }
 0x3c0   : > { %1631 = vmatprep.subr.msk.mxu0 %vm1281_vm2, %v1772_v12 }
 0x3c1   : > { %1632 = vmatpush1.msk.msra.mxu0 %vm1280_vm14, %v1772_v12 }
 0x3c2   : > { %1633 = vmatprep.subr.msk.mxu0 %vm1279_vm15, %v1772_v12 }
 0x3c3   : > { %1634 = vmatpush1.msk.msra.mxu0 %vm1278_vm0, %v1772_v12 }
 0x3c4   : > { %1635 = vmatprep.subr.msk.mxu0 %vm1277_vm1, %v1772_v12 }
 0x3c5   : > { %1636 = vmatpush1.msk.msra.mxu0 %vm1276_vm3, %v1772_v12 }
 0x3c6   : > { %1637 = vmatprep.subr.msk.mxu0 %vm1275_vm4, %v1772_v12 }
 0x3c7   : > { %1638 = vmatpush1.msk.msra.mxu0 %vm1274_vm5, %v1772_v12 }
 0x3c8   : > { %1639 = vmatmul.mubr.msk.f32.vlgmr.msra.gmra.mxu0 %vm500_vm13, %v2072_v24 }
 0x3c9   : > { %1368 = vmatprep.mubr.f32.mxu0 %v1770_v0 }
 0x3cc   : > { %1640 = vmatmul.mubr.msk.f32.gmra.mxu0 %vm500_vm13, %v2091_v25 }
 0x488   : > { %v1364_v18 = vpop.f32.mrf.mxu0 }
 0x489   : > { %v1365_v40 = vadd.f32 %v1364_v18, %v2117_v26 }
 0x48a   : > { %v1366_v55 = vpop.f32.mrf.mxu0 }
 0x48b   : > { %1641 = vst [vmem:[%s2122_s13 + $0x60] sm:$0xff] %v1365_v40  ;;  %v1367_v63 = vadd.f32 %v1366_v55, %v2117_v26 }
 0x48c   : > { %v1370_v20 = vpop.f32.mrf.mxu0 }
 0x48d   : > { %1642 = vst [vmem:[%s2122_s13 + $0x68] sm:$0xff] %v1367_v63  ;;  %v1371_v12 = vadd.f32 %v1370_v20, %v2126_v54 }
 0x48e   : > { %v1372_v42 = vpop.f32.mrf.mxu0 }
 0x48f   : > { %1643 = vst [vmem:[%s2122_s13 + $0x70] sm:$0xff] %v1371_v12  ;;  %v1373_v24 = vadd.f32 %v1372_v42, %v2126_v54 }
 0x491   : > { %1644 = vst [vmem:[%s2122_s13 + $0x78] sm:$0xff] %v1373_v24 }
 0x492   : > { %s1651_s7 = sshll.u32 %s1831_s22, 9  ;;  %s1404_s17 = sshll.u32 %s2122_s13, 4  ;;  %s1405_s17 = int_to_ptr.vmem [resolvable:$true] %s1404_s17 }
 0x493   : > { %s1393_s12 = scalar_lea.hbm %s2526_s5, %s1651_s7  ;;  %s1773_s15 = smov 512  }
 0x494   : > { %1661 = sst [smem:[#allocation9]] (%p1858_p9), %s1773_s15  ;;  %s1774_s14 = smov 1024  }
 0x495   : > { %1662 = sst [smem:[#allocation9 + $0x1]] (%p1858_p9), %s1774_s14  ;;  %s1775_s23 = smov 2  }
 0x496   : > { %1663 = sst [smem:[#allocation9 + $0x2]] (%p1858_p9), %s1775_s23  ;;  %s1776_s25 = smov 256  }
 0x497   : > { %1664 = sst [smem:[#allocation9 + $0x3]] (%p1858_p9), %s1776_s25  ;;  %s1777_s22 = smov 16  }
 0x498   : > { %1665 = sst [smem:[#allocation9 + $0x4]] (%p1858_p9), %s1776_s25  ;;  %s1778_s26 = smov 131072  }
 0x499   : > { %1666 = sst [smem:[#allocation9 + $0x5]] (%p1858_p9), %s1777_s22  ;;  %s1779_s8 = smov 0  }
 0x49a   : > { %1667 = dma.general (%p1858_p9), %s1405_s17, 2048, %s1393_s12, %s1381_s16, %s1778_s26, [#allocation9], %s1779_s8, 0  }
 0x49b PF: > { %s1432_s9 = sand.u32 1, %s1750_s18   ;;  %p1670_p1 = pnand %p1492_p11, %p1862_p10 }
 0x49c   : > { %s1433_s10 = scalar_lea.sflag [#allocation4], %s1432_s9 }
 0x49d   : > { %p1671_p2 = pneg %p1670_p1 }
 0x49f   : > { %1745 = dma.done.wait (%p1671_p2), %s1433_s10, 2048  }
 0x4a0   : > { %1747 = vsyncadd (%p1671_p2), %s1433_s10, 4294965248  ;;  %p18_p3 = scmp.ge.s32.totalorder %s1835_s24, 4   ;;  %s2531_s18 = smov %s1754_s19 }
 0x4a1   : > { %s2532_s19 = smov %s1758_s20  ;;  %s2533_s20 = smov %s1847_s27 }
 0x4a2   : > { %s2534_s21 = smov %s1835_s24  ;;  %20 = sbr.rel (!%p18_p3) target bundleno = 5 (0x5), region = 101 }
 0x4a7   :  { %1438 = vsyncpa [#allocation3], 1 }
 0x4a8   :  { %1440 = vsyncpa [#allocation3 + $0x1], 1 }
 0x4a9   :  { %1441 = vsyncpa [#allocation4], 1 }
 0x4aa   :  { %1443 = vsyncpa [#allocation4 + $0x1], 1 }

</bundles_post_ra>
